<compile_context>
chip_gen: v6e
topology: v6e:2x2x1
jax: 0.10.0
libtpu: 0.0.40
codegen_flags: <defaults>
</compile_context>

<pallas_src>
import functools

import jax
import jax.numpy as jnp
from jax.experimental import pallas as pl
from jax.experimental.pallas import tpu as pltpu


def _round_up(x, m):
    return ((x + m - 1) // m) * m


# ----------------------------------------------------------------------------
# Kernel: one (tm, tn) output tile, accumulated over the K grid axis.
# ----------------------------------------------------------------------------
def _ws_linear_kernel(x_ref, wt_ref, b_ref, o_ref, acc_ref):
    k = pl.program_id(2)

    @pl.when(k == 0)
    def _():
        acc_ref[...] = jnp.zeros_like(acc_ref)

    acc_ref[...] += jnp.dot(
        x_ref[...], wt_ref[...], preferred_element_type=jnp.float32
    )

    @pl.when(k == pl.num_programs(2) - 1)
    def _():
        o_ref[...] = (acc_ref[...] + b_ref[...]).astype(o_ref.dtype)


# ----------------------------------------------------------------------------
# Wrapper: y = (x * scale) @ W.T + b, with scale already folded into `wt`.
#   x:  (M, K)      activations
#   wt: (K, N)      pre-transposed weight with sqrt(2/K) folded in
#   b:  (N,)        bias
# ----------------------------------------------------------------------------
@functools.partial(jax.jit, static_argnames=("tm", "tn", "tk"))
def ws_linear(x, wt, b, *, tm=256, tn=256, tk=512):
    M, K = x.shape
    Kw, N = wt.shape
    assert K == Kw and b.shape == (N,)

    # Pad to (8, 128)-friendly sizes, then clamp tile sizes to the padded dims.
    Mp = _round_up(M, 8)
    Kp = _round_up(K, 128)
    Np = _round_up(N, 128)
    tm = min(tm, Mp)
    tk = min(tk, Kp)
    tn = min(tn, Np)
    Mp = _round_up(Mp, tm)
    Kp = _round_up(Kp, tk)
    Np = _round_up(Np, tn)

    x_p = jnp.pad(x, ((0, Mp - M), (0, Kp - K)))
    wt_p = jnp.pad(wt, ((0, Kp - K), (0, Np - N)))
    b_p = jnp.pad(b.reshape(1, N), ((0, 0), (0, Np - N)))

    grid = (Mp // tm, Np // tn, Kp // tk)

    out_p = pl.pallas_call(
        _ws_linear_kernel,
        out_shape=jax.ShapeDtypeStruct((Mp, Np), x.dtype),
        grid=grid,
        in_specs=[
            pl.BlockSpec((tm, tk), lambda i, j, k: (i, k)),
            pl.BlockSpec((tk, tn), lambda i, j, k: (k, j)),
            pl.BlockSpec((1, tn), lambda i, j, k: (0, j)),
        ],
        out_specs=pl.BlockSpec((tm, tn), lambda i, j, k: (i, j)),
        scratch_shapes=[pltpu.VMEM((tm, tn), jnp.float32)],
        compiler_params=pltpu.CompilerParams(
            dimension_semantics=("parallel", "parallel", "arbitrary")
        ),
    )(x_p, wt_p, b_p)

    return out_p[:M, :N]


# ----------------------------------------------------------------------------
# Parameter construction mirroring WSLinear.__init__:
#   weight ~ N(0, 1)  (out_features, in_features), bias = 0.
# The WS scale sqrt(2/in_features) is folded into the pre-transposed weight
# here (exact: scalar commutes through the matmul).
# ----------------------------------------------------------------------------
def make_ws_linear_params(key, in_features, out_features):
    weight = jax.random.normal(key, (out_features, in_features), jnp.float32)
    scale = (2.0 / in_features) ** 0.5
    wt_folded = (weight * scale).T  # (in_features, out_features)
    bias = jnp.zeros((out_features,), jnp.float32)
    return weight, wt_folded, bias


def _reference_ws_linear(x, weight, bias):
    scale = (2.0 / weight.shape[1]) ** 0.5
    return (x * scale) @ weight.T + bias


if __name__ == "__main__":
    key = jax.random.PRNGKey(0)
    k_w1, k_x1, k_w2, k_x2 = jax.random.split(key, 4)

    # Case 1: small, "nice" shapes (batch=2, hidden=32).
    B, in_f, out_f = 2, 32, 32
    weight, wt_folded, bias = make_ws_linear_params(k_w1, in_f, out_f)
    x = jax.random.normal(k_x1, (B, in_f), jnp.float32)
    out = jax.block_until_ready(ws_linear(x, wt_folded, bias))
    ref = _reference_ws_linear(x, weight, bias)
    assert out.shape == (B, out_f) and out.dtype == jnp.float32
    assert bool(jnp.all(jnp.isfinite(out)))
    assert bool(jnp.max(jnp.abs(out - ref)) < 1e-4), "mismatch vs reference (case 1)"

    # Case 2: deliberately unaligned shapes to exercise the padding path.
    B2, in_f2, out_f2 = 5, 48, 72
    weight2, wt_folded2, bias2 = make_ws_linear_params(k_w2, in_f2, out_f2)
    x2 = jax.random.normal(k_x2, (B2, in_f2), jnp.float32)
    out2 = jax.block_until_ready(ws_linear(x2, wt_folded2, bias2))
    ref2 = _reference_ws_linear(x2, weight2, bias2)
    assert out2.shape == (B2, out_f2)
    assert bool(jnp.max(jnp.abs(out2 - ref2)) < 1e-4), "mismatch vs reference (case 2)"

    print("KERNEL_OK")
</pallas_src>

<mosaic_0001>
module attributes {stable_mosaic.version = 11 : i64} {
  func.func @_ws_linear_kernel(%arg0: i32, %arg1: i32, %arg2: i32, %arg3: memref<8x128xf32, #tpu.memory_space<vmem>>, %arg4: memref<128x128xf32, #tpu.memory_space<vmem>>, %arg5: memref<1x128xf32, #tpu.memory_space<vmem>>, %arg6: memref<8x128xf32, #tpu.memory_space<vmem>>, %arg7: memref<8x128xf32, #tpu.memory_space<vmem>>) attributes {dimension_semantics = [#tpu.dimension_semantics<parallel>, #tpu.dimension_semantics<parallel>, #tpu.dimension_semantics<arbitrary>], iteration_bounds = array<i64: 1, 1, 1>, scalar_prefetch = 0 : i64, scratch_operands = 1 : i64, tpu.core_type = #tpu.core_type<tc>, window_params = [{transform_indices = @transform_0, window_bounds = array<i64: 8, 128>}, {transform_indices = @transform_1, window_bounds = array<i64: 128, 128>}, {transform_indices = @transform_2, window_bounds = array<i64: 1, 128>}, {transform_indices = @transform_3, window_bounds = array<i64: 8, 128>}]} {
    %c0_i32 = arith.constant 0 : i32
    %0 = arith.cmpi eq, %arg2, %c0_i32 : i32
    %1 = arith.extui %0 : i1 to i32
    %c0_i32_0 = arith.constant 0 : i32
    %2 = arith.cmpi ne, %1, %c0_i32_0 : i32
    scf.if %2 {
      %cst_10 = arith.constant 0.000000e+00 : f32
      %12 = vector.broadcast %cst_10 : f32 to vector<8x128xf32>
      %c0_11 = arith.constant 0 : index
      %c0_12 = arith.constant 0 : index
      %13 = vector.load %arg7[%c0_11, %c0_12] : memref<8x128xf32, #tpu.memory_space<vmem>>, vector<8x128xf32>
      tpu.vector_store %arg7[%c0_11, %c0_12], %12 {strides = array<i32>} : memref<8x128xf32, #tpu.memory_space<vmem>>, vector<8x128xf32>,
    } else {
    }
    %c0 = arith.constant 0 : index
    %c0_1 = arith.constant 0 : index
    %3 = vector.load %arg7[%c0, %c0_1] : memref<8x128xf32, #tpu.memory_space<vmem>>, vector<8x128xf32>
    %c0_2 = arith.constant 0 : index
    %c0_3 = arith.constant 0 : index
    %4 = vector.load %arg3[%c0_2, %c0_3] : memref<8x128xf32, #tpu.memory_space<vmem>>, vector<8x128xf32>
    %c0_4 = arith.constant 0 : index
    %c0_5 = arith.constant 0 : index
    %5 = vector.load %arg4[%c0_4, %c0_5] : memref<128x128xf32, #tpu.memory_space<vmem>>, vector<128x128xf32>
    %cst = arith.constant dense<0.000000e+00> : vector<8x128xf32>
    %6 = tpu.matmul %4, %5, %cst {dimension_numbers = #tpu.dot_dimension_numbers<[1], [0], [0], [1], [0, 0, 1, 1], [], []>} : vector<8x128xf32>, vector<128x128xf32>, vector<8x128xf32> -> vector<8x128xf32>
    %7 = arith.addf %3, %6 : vector<8x128xf32>
    %c0_6 = arith.constant 0 : index
    %c0_7 = arith.constant 0 : index
    %8 = vector.load %arg7[%c0_6, %c0_7] : memref<8x128xf32, #tpu.memory_space<vmem>>, vector<8x128xf32>
    tpu.vector_store %arg7[%c0_6, %c0_7], %7 {strides = array<i32>} : memref<8x128xf32, #tpu.memory_space<vmem>>, vector<8x128xf32>,
    %c0_i32_8 = arith.constant 0 : i32
    %9 = arith.cmpi eq, %arg2, %c0_i32_8 : i32
    %10 = arith.extui %9 : i1 to i32
    %c0_i32_9 = arith.constant 0 : i32
    %11 = arith.cmpi ne, %10, %c0_i32_9 : i32
    scf.if %11 {
      %c0_10 = arith.constant 0 : index
      %c0_11 = arith.constant 0 : index
      %12 = vector.load %arg7[%c0_10, %c0_11] : memref<8x128xf32, #tpu.memory_space<vmem>>, vector<8x128xf32>
      %c0_12 = arith.constant 0 : index
      %c0_13 = arith.constant 0 : index
      %13 = vector.load %arg5[%c0_12, %c0_13] : memref<1x128xf32, #tpu.memory_space<vmem>>, vector<1x128xf32>
      %14 = vector.broadcast %13 : vector<1x128xf32> to vector<8x128xf32>
      %15 = arith.addf %12, %14 : vector<8x128xf32>
      %c0_14 = arith.constant 0 : index
      %c0_15 = arith.constant 0 : index
      %16 = vector.load %arg6[%c0_14, %c0_15] : memref<8x128xf32, #tpu.memory_space<vmem>>, vector<8x128xf32>
      tpu.vector_store %arg6[%c0_14, %c0_15], %15 {strides = array<i32>} : memref<8x128xf32, #tpu.memory_space<vmem>>, vector<8x128xf32>,
    } else {
    }
    return
  }
  func.func @transform_0(%arg0: i32, %arg1: i32, %arg2: i32) -> (i32, i32) {
    %c0_i32 = arith.constant 0 : i32
    return %arg0, %arg2 : i32, i32
  }
  func.func @transform_1(%arg0: i32, %arg1: i32, %arg2: i32) -> (i32, i32) {
    %c0_i32 = arith.constant 0 : i32
    return %arg2, %arg1 : i32, i32
  }
  func.func @transform_2(%arg0: i32, %arg1: i32, %arg2: i32) -> (i32, i32) {
    %c0_i32 = arith.constant 0 : i32
    %c0_i32_0 = arith.constant 0 : i32
    return %c0_i32, %arg1 : i32, i32
  }
  func.func @transform_3(%arg0: i32, %arg1: i32, %arg2: i32) -> (i32, i32) {
    %c0_i32 = arith.constant 0 : i32
    return %arg0, %arg1 : i32, i32
  }
}

</mosaic_0001>

<bundles_post_ra>
// kernel: ws_linear.1
= control target key start
LH: loop header
LB: loop body
LE: loop exit
PB: predicated region body
PF: predicated region fallthrough
CT: control target
= control target key end

     0   :  { %v181_v0 = vmov 0.0   ;;  %vm182_vm0 = vmmov 0   ;;  %s260_s1 = inlined_call_operand.vmem [shape: f32[128,128], index: 1, kind: input, shape index: {}]   ;;  %s261_s0 = inlined_call_operand.vmem [shape: f32[8,128], index: 0, kind: input, shape index: {}]   ;;  %s262_s2 = inlined_call_operand.vmem [shape: f32[1,128], index: 2, kind: input, shape index: {}]   ;;  %s263_s3 = inlined_call_operand.vmem [shape: f32[8,128], index: 3, kind: output, shape index: {}]  }
   0x1   :  { %144 = vmatprep.subr.mxu0 %v181_v0  ;;  %v36_v1 = vld [vmem:[%s260_s1 + $0x78] sm:$0xff]  ;;  %v35_v2 = vld [vmem:[%s260_s1 + $0x70] sm:$0xff]  ;;  %176 = vmatprep.mubr.msk.f32.mxu0 %vm182_vm0, %v181_v0  ;;  %v34_v3 = vld [vmem:[%s260_s1 + $0x68] sm:$0xff] }
   0x2   :  { %145 = vmatpush3.msra.mxu0 %v36_v1  ;;  %v33_v4 = vld [vmem:[%s260_s1 + $0x60] sm:$0xff]  ;;  %v32_v5 = vld [vmem:[%s260_s1 + $0x58] sm:$0xff]  ;;  %v31_v6 = vld [vmem:[%s260_s1 + $0x50] sm:$0xff] }
   0x3   :  { %146 = vmatprep.subr.mxu0 %v181_v0  ;;  %v30_v7 = vld [vmem:[%s260_s1 + $0x48] sm:$0xff]  ;;  %v29_v8 = vld [vmem:[%s260_s1 + $0x40] sm:$0xff]  ;;  %v28_v9 = vld [vmem:[%s260_s1 + $0x38] sm:$0xff] }
   0x4   :  { %147 = vmatpush3.msra.mxu0 %v35_v2  ;;  %v27_v10 = vld [vmem:[%s260_s1 + $0x30] sm:$0xff]  ;;  %v26_v11 = vld [vmem:[%s260_s1 + $0x28] sm:$0xff]  ;;  %v25_v12 = vld [vmem:[%s260_s1 + $0x20] sm:$0xff] }
   0x5   :  { %148 = vmatprep.subr.mxu0 %v181_v0  ;;  %v24_v13 = vld [vmem:[%s260_s1 + $0x18] sm:$0xff]  ;;  %v23_v14 = vld [vmem:[%s260_s1 + $0x10] sm:$0xff]  ;;  %v22_v15 = vld [vmem:[%s260_s1 + $0x8] sm:$0xff] }
   0x6   :  { %149 = vmatpush3.msra.mxu0 %v34_v3  ;;  %v21_v16 = vld [vmem:[%s260_s1] sm:$0xff] }
   0x7   :  { %150 = vmatprep.subr.mxu0 %v181_v0  ;;  %v20_v17 = vld [vmem:[%s261_s0] sm:$0xff] }
   0x8   :  { %151 = vmatpush3.msra.mxu0 %v33_v4  ;;  %v126_v18 = vld [vmem:[%s262_s2] ss:$0 sm:$0xff] }
   0x9   :  { %152 = vmatprep.subr.mxu0 %v181_v0 }
   0xa   :  { %153 = vmatpush3.msra.mxu0 %v32_v5 }
   0xb   :  { %154 = vmatprep.subr.mxu0 %v181_v0 }
   0xc   :  { %155 = vmatpush3.msra.mxu0 %v31_v6 }
   0xd   :  { %156 = vmatprep.subr.mxu0 %v181_v0 }
   0xe   :  { %157 = vmatpush3.msra.mxu0 %v30_v7 }
   0xf   :  { %158 = vmatprep.subr.mxu0 %v181_v0 }
  0x10   :  { %159 = vmatpush3.msra.mxu0 %v29_v8 }
  0x11   :  { %160 = vmatprep.subr.mxu0 %v181_v0 }
  0x12   :  { %161 = vmatpush3.msra.mxu0 %v28_v9 }
  0x13   :  { %162 = vmatprep.subr.mxu0 %v181_v0 }
  0x14   :  { %163 = vmatpush3.msra.mxu0 %v27_v10 }
  0x15   :  { %164 = vmatprep.subr.mxu0 %v181_v0 }
  0x16   :  { %165 = vmatpush3.msra.mxu0 %v26_v11 }
  0x17   :  { %166 = vmatprep.subr.mxu0 %v181_v0 }
  0x18   :  { %167 = vmatpush3.msra.mxu0 %v25_v12 }
  0x19   :  { %168 = vmatprep.subr.mxu0 %v181_v0 }
  0x1a   :  { %169 = vmatpush3.msra.mxu0 %v24_v13 }
  0x1b   :  { %170 = vmatprep.subr.mxu0 %v181_v0 }
  0x1c   :  { %171 = vmatpush3.msra.mxu0 %v23_v14 }
  0x1d   :  { %172 = vmatprep.subr.mxu0 %v181_v0 }
  0x1e   :  { %173 = vmatpush3.msra.mxu0 %v22_v15 }
  0x1f   :  { %174 = vmatprep.subr.mxu0 %v181_v0 }
  0x20   :  { %175 = vmatpush3.msra.mxu0 %v21_v16 }
  0x21   :  { %177 = vmatmul.mubr.f32.vlgmr.msra.gmra.mxu0 %v20_v17 }
  0xe1   :  { %v103_v19 = vpop.f32.mrf.mxu0 }
  0xe2   :  { %v120_v20 = vadd.f32 %v126_v18, %v103_v19 }
  0xe3   :  { %v178_v21 = vpop.f32.mrf.mxu0 }
  0xe4   :  { %121 = vst [vmem:[%s263_s3] sm:$0xff] %v120_v20 }

</bundles_post_ra>
